<compile_context>
chip_gen: v7x
topology: tpu7x:2x2x1
jax: 0.10.0
libtpu: 0.0.40
codegen_flags: <defaults>
</compile_context>

<pallas_src>
import functools

import jax
import jax.numpy as jnp
from jax.experimental import pallas as pl
from jax.experimental.pallas import tpu as pltpu

_LANE = 128
_MAX_TILE_N = 1024
_VMEM_LIMIT = 32 * 1024 * 1024


def _round_up(x, m):
    return (x + m - 1) // m * m


def pad_table(table):
    """Pad/cast the (V, V) embedding table to (V_pad, V_pad) f32 ONCE at init."""
    v = table.shape[0]
    v_pad = _round_up(max(v, _LANE), _LANE)          # 65 -> 128
    return jnp.pad(table.astype(jnp.float32), ((0, v_pad - v), (0, v_pad - v)))


def _plan(n):
    """Static tiling plan for the flattened token axis."""
    tile_n = min(_MAX_TILE_N, _round_up(n, 8))
    n_pad = _round_up(n, tile_n)
    num_tiles = n_pad // tile_n
    # Split the grid into 2 independent chunks when possible so the v7x
    # megacore can run the reduction on both TensorCores (no-op on v5e/v6e).
    num_chunks = 2 if (num_tiles >= 2 and num_tiles % 2 == 0) else 1
    tiles_per_chunk = num_tiles // num_chunks
    return tile_n, n_pad, num_tiles, num_chunks, tiles_per_chunk


# ----------------------------- kernels ------------------------------------


def _logits_kernel(idx_ref, table_ref, logits_ref):
    # idx_ref    : (TILE_N, 1) int32
    # table_ref  : (V_pad, V_pad) f32 (resident, constant index_map)
    # logits_ref : (TILE_N, V_pad) f32
    tile_n, v_pad = logits_ref.shape
    idx = idx_ref[...]                                             # (TILE_N, 1)
    col = jax.lax.broadcasted_iota(jnp.int32, (tile_n, v_pad), 1)
    onehot = (col == idx).astype(table_ref.dtype)                  # exact gather
    logits_ref[...] = jnp.dot(onehot, table_ref[...],
                              preferred_element_type=jnp.float32)


def _ce_tile(it, table, *, n_valid, v_valid, tile_n, tile_idx):
    """Per-tile logits + masked cross-entropy partial sum."""
    v_pad = table.shape[1]
    idx = it[:, 0:1]                                               # (TILE_N, 1)
    tgt = it[:, 1:2]                                               # (TILE_N, 1)
    col = jax.lax.broadcasted_iota(jnp.int32, (tile_n, v_pad), 1)

    # Embedding gather == one-hot(idx) @ table (MXU, 128-aligned, exact in f32).
    onehot = (col == idx).astype(jnp.float32)
    logits = jnp.dot(onehot, table, preferred_element_type=jnp.float32)

    # Numerically-stable logsumexp over the *valid* vocab columns only
    # (zero-padded table columns would otherwise contribute exp(0)).
    masked = jnp.where(col < v_valid, logits, jnp.float32(-1e30))
    m = jnp.max(masked, axis=-1, keepdims=True)
    lse = m + jnp.log(jnp.sum(jnp.exp(masked - m), axis=-1, keepdims=True))
    picked = jnp.sum(jnp.where(col == tgt, logits, jnp.float32(0.0)),
                     axis=-1, keepdims=True)

    # Mask padded rows (global row index >= n_valid) out of the loss.
    row = jax.lax.broadcasted_iota(jnp.int32, (tile_n, 1), 0) + tile_idx * tile_n
    row_valid = (row < n_valid).astype(jnp.float32)
    partial = jnp.sum((lse - picked) * row_valid)                  # scalar
    return logits, partial


def _loss_kernel(it_ref, table_ref, logits_ref, partial_ref, acc_ref,
                 *, n_valid, v_valid, tile_n, tiles_per_chunk):
    # it_ref      : (TILE_N, 2) int32  (col 0 = idx, col 1 = target)
    # table_ref   : (V_pad, V_pad) f32
    # logits_ref  : (TILE_N, V_pad) f32
    # partial_ref : (8, 128) f32 per-chunk slot (written on last inner step)
    # acc_ref     : (1, 1) f32 VMEM scratch (per-core running CE sum)
    c = pl.program_id(0)
    j = pl.program_id(1)
    tile_idx = c * tiles_per_chunk + j

    logits, partial = _ce_tile(it_ref[...], table_ref[...], n_valid=n_valid,
                               v_valid=v_valid, tile_n=tile_n, tile_idx=tile_idx)
    logits_ref[...] = logits

    @pl.when(j == 0)
    def _():
        acc_ref[...] = jnp.zeros_like(acc_ref)

    acc_ref[...] += partial.reshape(1, 1)

    @pl.when(j == pl.num_programs(1) - 1)
    def _():
        # Lane/sublane-dense (8, 128) block per chunk; wrapper reads [c*8, 0].
        partial_ref[...] = jnp.broadcast_to(acc_ref[...], partial_ref.shape)


def _loss_only_kernel(it_ref, table_ref, partial_ref, acc_ref,
                      *, n_valid, v_valid, tile_n, tiles_per_chunk):
    # Same as _loss_kernel but with no logits output (no bulk HBM writeback).
    c = pl.program_id(0)
    j = pl.program_id(1)
    tile_idx = c * tiles_per_chunk + j

    _, partial = _ce_tile(it_ref[...], table_ref[...], n_valid=n_valid,
                          v_valid=v_valid, tile_n=tile_n, tile_idx=tile_idx)

    @pl.when(j == 0)
    def _():
        acc_ref[...] = jnp.zeros_like(acc_ref)

    acc_ref[...] += partial.reshape(1, 1)

    @pl.when(j == pl.num_programs(1) - 1)
    def _():
        partial_ref[...] = jnp.broadcast_to(acc_ref[...], partial_ref.shape)


# ----------------------------- wrappers ------------------------------------


def _pack_tokens(idx_flat, tgt_flat, n_pad):
    n = idx_flat.shape[0]
    it = jnp.stack([idx_flat.astype(jnp.int32), tgt_flat.astype(jnp.int32)],
                   axis=1)                                          # (n, 2)
    return jnp.pad(it, ((0, n_pad - n), (0, 0)))


@functools.partial(jax.jit, static_argnames=("v_valid",))
def _bigram_train(idx_flat, tgt_flat, table_p, *, v_valid):
    n = idx_flat.shape[0]
    v_pad = table_p.shape[0]
    tile_n, n_pad, _, num_chunks, tiles_per_chunk = _plan(n)
    it_p = _pack_tokens(idx_flat, tgt_flat, n_pad)

    kernel = functools.partial(_loss_kernel, n_valid=n, v_valid=v_valid,
                               tile_n=tile_n, tiles_per_chunk=tiles_per_chunk)
    it_spec = pl.BlockSpec((tile_n, 2), lambda c, j: (c * tiles_per_chunk + j, 0))
    table_spec = pl.BlockSpec((v_pad, v_pad), lambda c, j: (0, 0))     # resident
    logits_spec = pl.BlockSpec((tile_n, v_pad),
                               lambda c, j: (c * tiles_per_chunk + j, 0))
    partial_spec = pl.BlockSpec((8, _LANE), lambda c, j: (c, 0))

    logits_p, partials = pl.pallas_call(
        kernel,
        out_shape=(jax.ShapeDtypeStruct((n_pad, v_pad), jnp.float32),
                   jax.ShapeDtypeStruct((num_chunks * 8, _LANE), jnp.float32)),
        grid_spec=pltpu.PrefetchScalarGridSpec(
            num_scalar_prefetch=0,
            grid=(num_chunks, tiles_per_chunk),
            in_specs=[it_spec, table_spec],
            out_specs=(logits_spec, partial_spec),
            scratch_shapes=[pltpu.VMEM((1, 1), jnp.float32)]),
        compiler_params=pltpu.CompilerParams(
            # Outer chunk axis independent (megacore-splittable on v7x),
            # inner tile axis carries the per-chunk CE accumulator.
            dimension_semantics=("parallel", "arbitrary"),
            vmem_limit_bytes=_VMEM_LIMIT),
    )(it_p, table_p)

    loss = jnp.sum(partials[0::8, 0]) / jnp.float32(n)
    # Slice back to the module's (B*T, V) contract.  Perf-sensitive consumers
    # that tolerate the 128-wide padded vocab should consume logits_p directly.
    return logits_p[:n, :v_valid], loss


@functools.partial(jax.jit, static_argnames=("v_valid",))
def _bigram_loss_only(idx_flat, tgt_flat, table_p, *, v_valid):
    n = idx_flat.shape[0]
    v_pad = table_p.shape[0]
    tile_n, n_pad, _, num_chunks, tiles_per_chunk = _plan(n)
    it_p = _pack_tokens(idx_flat, tgt_flat, n_pad)

    kernel = functools.partial(_loss_only_kernel, n_valid=n, v_valid=v_valid,
                               tile_n=tile_n, tiles_per_chunk=tiles_per_chunk)
    partials = pl.pallas_call(
        kernel,
        out_shape=jax.ShapeDtypeStruct((num_chunks * 8, _LANE), jnp.float32),
        grid_spec=pltpu.PrefetchScalarGridSpec(
            num_scalar_prefetch=0,
            grid=(num_chunks, tiles_per_chunk),
            in_specs=[pl.BlockSpec((tile_n, 2),
                                   lambda c, j: (c * tiles_per_chunk + j, 0)),
                      pl.BlockSpec((v_pad, v_pad), lambda c, j: (0, 0))],
            out_specs=pl.BlockSpec((8, _LANE), lambda c, j: (c, 0)),
            scratch_shapes=[pltpu.VMEM((1, 1), jnp.float32)]),
        compiler_params=pltpu.CompilerParams(
            dimension_semantics=("parallel", "arbitrary"),
            vmem_limit_bytes=_VMEM_LIMIT),
    )(it_p, table_p)
    return jnp.sum(partials[0::8, 0]) / jnp.float32(n)


@functools.partial(jax.jit, static_argnames=("v_valid",))
def _bigram_infer(idx_flat, table_p, *, v_valid):
    n = idx_flat.shape[0]
    v_pad = table_p.shape[0]
    tile_n, n_pad, num_tiles, _, _ = _plan(n)
    idx_p = jnp.pad(idx_flat.astype(jnp.int32), (0, n_pad - n)).reshape(n_pad, 1)

    logits_p = pl.pallas_call(
        _logits_kernel,
        out_shape=jax.ShapeDtypeStruct((n_pad, v_pad), jnp.float32),
        grid_spec=pltpu.PrefetchScalarGridSpec(
            num_scalar_prefetch=0,
            grid=(num_tiles,),
            in_specs=[pl.BlockSpec((tile_n, 1), lambda i: (i, 0)),
                      pl.BlockSpec((v_pad, v_pad), lambda i: (0, 0))],
            out_specs=pl.BlockSpec((tile_n, v_pad), lambda i: (i, 0))),
        compiler_params=pltpu.CompilerParams(
            dimension_semantics=("parallel",),
            vmem_limit_bytes=_VMEM_LIMIT),
    )(idx_p, table_p)
    return logits_p[:n, :v_valid]


def bigram_forward(table_p, vocab_size, idx, targets=None):
    """Mirror of BigramLM.forward.

    table_p: pre-padded (V_pad, V_pad) f32 table from pad_table().
    Returns (logits, loss):
      - targets is None  -> logits shape (B, T, V), loss is None
      - targets provided -> logits shape (B*T, V), loss is a scalar float32
    """
    b, t = idx.shape
    idx_flat = idx.reshape(b * t)
    if targets is None:
        # TODO(synk): for autoregressive generate(), bucket the flattened
        # length (or use a last-token-only path) to avoid per-step retraces.
        logits = _bigram_infer(idx_flat, table_p, v_valid=vocab_size)
        return logits.reshape(b, t, vocab_size), None
    logits, loss = _bigram_train(idx_flat, targets.reshape(b * t), table_p,
                                 v_valid=vocab_size)
    return logits, loss


def bigram_loss(table_p, vocab_size, idx, targets):
    """Loss-only fast path (no logits HBM writeback) for training/eval loops."""
    b, t = idx.shape
    return _bigram_loss_only(idx.reshape(b * t), targets.reshape(b * t),
                             table_p, v_valid=vocab_size)


if __name__ == "__main__":
    # Small shapes consistent with the module: block_size = 8, tiny batch,
    # nanoGPT vocab of 65.
    vocab_size = 65
    batch = 2
    block_size = 8

    key = jax.random.PRNGKey(0)
    k_table, k_idx, k_tgt = jax.random.split(key, 3)

    # Deterministic parameter init (nn.Embedding default ~ N(0, 1)).
    table = jax.random.normal(k_table, (vocab_size, vocab_size), dtype=jnp.float32)
    table_p = pad_table(table)          # hoisted: pad once at parameter init

    idx = jax.random.randint(k_idx, (batch, block_size), 0, vocab_size,
                             dtype=jnp.int32)
    targets = jax.random.randint(k_tgt, (batch, block_size), 0, vocab_size,
                                 dtype=jnp.int32)

    # Forward with targets (training path: logits + loss).
    logits, loss = bigram_forward(table_p, vocab_size, idx, targets)
    logits = jax.block_until_ready(logits)
    loss = jax.block_until_ready(loss)

    # Forward without targets (generation path: logits only).
    logits_gen, loss_none = bigram_forward(table_p, vocab_size, idx, None)
    logits_gen = jax.block_until_ready(logits_gen)

    # Loss-only fast path.
    loss_only = jax.block_until_ready(bigram_loss(table_p, vocab_size, idx, targets))

    # Pure-JAX reference check.
    n = batch * block_size
    ref_logits = table[idx.reshape(-1)]
    ref_lse = jax.scipy.special.logsumexp(ref_logits, axis=-1)
    ref_loss = jnp.mean(ref_lse - ref_logits[jnp.arange(n), targets.reshape(-1)])

    assert logits.shape == (n, vocab_size)
    assert logits_gen.shape == (batch, block_size, vocab_size)
    assert loss_none is None
    assert jnp.allclose(logits, ref_logits, atol=1e-5)
    assert jnp.allclose(logits_gen,
                        ref_logits.reshape(batch, block_size, vocab_size),
                        atol=1e-5)
    assert jnp.allclose(loss, ref_loss, atol=1e-5)
    assert jnp.allclose(loss_only, ref_loss, atol=1e-5)

    print("KERNEL_OK")
</pallas_src>

<mosaic_0001>
module attributes {stable_mosaic.version = 11 : i64} {
  func.func @_loss_kernel(%arg0: i32, %arg1: i32, %arg2: memref<16x2xi32, #tpu.memory_space<vmem>>, %arg3: memref<128x128xf32, #tpu.memory_space<vmem>>, %arg4: memref<16x128xf32, #tpu.memory_space<vmem>>, %arg5: memref<8x128xf32, #tpu.memory_space<vmem>>, %arg6: memref<1x1xf32, #tpu.memory_space<vmem>>) attributes {dimension_semantics = [#tpu.dimension_semantics<parallel>, #tpu.dimension_semantics<arbitrary>], iteration_bounds = array<i64: 1, 1>, scalar_prefetch = 0 : i64, scratch_operands = 1 : i64, tpu.core_type = #tpu.core_type<tc>, window_params = [{transform_indices = @transform_0, window_bounds = array<i64: 16, 2>}, {pipeline_mode = #tpu.pipeline_mode<synchronous>, transform_indices = @transform_1, window_bounds = array<i64: 128, 128>}, {transform_indices = @transform_2, window_bounds = array<i64: 16, 128>}, {transform_indices = @transform_3, window_bounds = array<i64: 8, 128>}]} {
    %c1_i32 = arith.constant 1 : i32
    %0 = arith.muli %arg0, %c1_i32 : i32
    %1 = arith.addi %0, %arg1 : i32
    %c0 = arith.constant 0 : index
    %c0_0 = arith.constant 0 : index
    %2 = vector.load %arg2[%c0, %c0_0] : memref<16x2xi32, #tpu.memory_space<vmem>>, vector<16x2xi32>
    %c0_1 = arith.constant 0 : index
    %c0_2 = arith.constant 0 : index
    %3 = vector.load %arg3[%c0_1, %c0_2] : memref<128x128xf32, #tpu.memory_space<vmem>>, vector<128x128xf32>
    %4 = vector.extract_strided_slice %2 {offsets = [0, 0], sizes = [16, 1], strides = [1, 1]} : vector<16x2xi32> to vector<16x1xi32>
    %5 = vector.extract_strided_slice %2 {offsets = [0, 1], sizes = [16, 1], strides = [1, 1]} : vector<16x2xi32> to vector<16x1xi32>
    %6 = tpu.iota {dimensions = array<i32: 1>} : vector<16x128xi32>
    %7 = vector.broadcast %4 : vector<16x1xi32> to vector<16x128xi32>
    %8 = arith.cmpi eq, %6, %7 : vector<16x128xi32>
    %9 = arith.extui %8 : vector<16x128xi1> to vector<16x128xi32>
    %10 = arith.sitofp %9 : vector<16x128xi32> to vector<16x128xf32>
    %cst = arith.constant dense<0.000000e+00> : vector<16x128xf32>
    %11 = tpu.matmul %10, %3, %cst {dimension_numbers = #tpu.dot_dimension_numbers<[1], [0], [0], [1], [0, 0, 1, 1], [], []>} : vector<16x128xf32>, vector<128x128xf32>, vector<16x128xf32> -> vector<16x128xf32>
    %c65_i32 = arith.constant 65 : i32
    %12 = vector.broadcast %c65_i32 : i32 to vector<16x128xi32>
    %13 = arith.cmpi slt, %6, %12 : vector<16x128xi32>
    %cst_3 = arith.constant -1.000000e+30 : f32
    %14 = vector.broadcast %cst_3 : f32 to vector<16x128xf32>
    %15 = arith.select %13, %11, %14 : vector<16x128xi1>, vector<16x128xf32>
    %cst_4 = arith.constant dense<0xFF800000> : vector<16xf32>
    %16 = vector.multi_reduction <maximumf>, %15, %cst_4 [1] : vector<16x128xf32> to vector<16xf32>
    %17 = vector.shape_cast %16 : vector<16xf32> to vector<16x1xf32>
    %18 = vector.broadcast %17 : vector<16x1xf32> to vector<16x128xf32>
    %19 = arith.subf %15, %18 : vector<16x128xf32>
    %20 = math.exp %19 : vector<16x128xf32>
    %cst_5 = arith.constant dense<0.000000e+00> : vector<16xf32>
    %21 = vector.multi_reduction <add>, %20, %cst_5 [1] : vector<16x128xf32> to vector<16xf32>
    %22 = vector.shape_cast %21 : vector<16xf32> to vector<16x1xf32>
    %23 = math.log %22 : vector<16x1xf32>
    %24 = arith.addf %17, %23 : vector<16x1xf32>
    %25 = vector.broadcast %5 : vector<16x1xi32> to vector<16x128xi32>
    %26 = arith.cmpi eq, %6, %25 : vector<16x128xi32>
    %cst_6 = arith.constant 0.000000e+00 : f32
    %27 = vector.broadcast %cst_6 : f32 to vector<16x128xf32>
    %28 = arith.select %26, %11, %27 : vector<16x128xi1>, vector<16x128xf32>
    %cst_7 = arith.constant dense<0.000000e+00> : vector<16xf32>
    %29 = vector.multi_reduction <add>, %28, %cst_7 [1] : vector<16x128xf32> to vector<16xf32>
    %30 = vector.shape_cast %29 : vector<16xf32> to vector<16x1xf32>
    %31 = tpu.iota {dimensions = array<i32: 0>} : vector<16x1xi32>
    %c16_i32 = arith.constant 16 : i32
    %32 = arith.muli %1, %c16_i32 : i32
    %33 = vector.broadcast %32 : i32 to vector<16x1xi32>
    %34 = arith.addi %31, %33 : vector<16x1xi32>
    %c16_i32_8 = arith.constant 16 : i32
    %35 = vector.broadcast %c16_i32_8 : i32 to vector<16x1xi32>
    %36 = arith.cmpi slt, %34, %35 : vector<16x1xi32>
    %37 = arith.extui %36 : vector<16x1xi1> to vector<16x1xi32>
    %38 = arith.sitofp %37 : vector<16x1xi32> to vector<16x1xf32>
    %39 = arith.subf %24, %30 : vector<16x1xf32>
    %40 = arith.mulf %39, %38 : vector<16x1xf32>
    %41 = vector.shape_cast %40 : vector<16x1xf32> to vector<1x16x1xf32>
    %cst_9 = arith.constant dense<0.000000e+00> : vector<1xf32>
    %42 = vector.multi_reduction <add>, %41, %cst_9 [1, 2] : vector<1x16x1xf32> to vector<1xf32>
    %43 = vector.shape_cast %42 : vector<1xf32> to vector<1x1x1xf32>
    %44 = vector.extract %43[0, 0, 0] : f32 from vector<1x1x1xf32>
    %c0_10 = arith.constant 0 : index
    %c0_11 = arith.constant 0 : index
    %45 = vector.load %arg4[%c0_10, %c0_11] : memref<16x128xf32, #tpu.memory_space<vmem>>, vector<16x128xf32>
    tpu.vector_store %arg4[%c0_10, %c0_11], %11 {strides = array<i32>} : memref<16x128xf32, #tpu.memory_space<vmem>>, vector<16x128xf32>,
    %c0_i32 = arith.constant 0 : i32
    %46 = arith.cmpi eq, %arg1, %c0_i32 : i32
    %47 = arith.extui %46 : i1 to i32
    %c0_i32_12 = arith.constant 0 : i32
    %48 = arith.cmpi ne, %47, %c0_i32_12 : i32
    scf.if %48 {
      %cst_19 = arith.constant 0.000000e+00 : f32
      %56 = vector.broadcast %cst_19 : f32 to vector<1x1xf32>
      %c0_20 = arith.constant 0 : index
      %c0_21 = arith.constant 0 : index
      %57 = vector.load %arg6[%c0_20, %c0_21] : memref<1x1xf32, #tpu.memory_space<vmem>>, vector<1x1xf32>
      tpu.vector_store %arg6[%c0_20, %c0_21], %56 {strides = array<i32>} : memref<1x1xf32, #tpu.memory_space<vmem>>, vector<1x1xf32>,
    } else {
    }
    %c0_13 = arith.constant 0 : index
    %c0_14 = arith.constant 0 : index
    %49 = vector.load %arg6[%c0_13, %c0_14] : memref<1x1xf32, #tpu.memory_space<vmem>>, vector<1x1xf32>
    %50 = vector.broadcast %44 : f32 to vector<1x1xf32>
    %51 = arith.addf %49, %50 : vector<1x1xf32>
    %c0_15 = arith.constant 0 : index
    %c0_16 = arith.constant 0 : index
    %52 = vector.load %arg6[%c0_15, %c0_16] : memref<1x1xf32, #tpu.memory_space<vmem>>, vector<1x1xf32>
    tpu.vector_store %arg6[%c0_15, %c0_16], %51 {strides = array<i32>} : memref<1x1xf32, #tpu.memory_space<vmem>>, vector<1x1xf32>,
    %c0_i32_17 = arith.constant 0 : i32
    %53 = arith.cmpi eq, %arg1, %c0_i32_17 : i32
    %54 = arith.extui %53 : i1 to i32
    %c0_i32_18 = arith.constant 0 : i32
    %55 = arith.cmpi ne, %54, %c0_i32_18 : i32
    scf.if %55 {
      %c0_19 = arith.constant 0 : index
      %c0_20 = arith.constant 0 : index
      %56 = vector.load %arg6[%c0_19, %c0_20] : memref<1x1xf32, #tpu.memory_space<vmem>>, vector<1x1xf32>
      %57 = vector.shape_cast %56 : vector<1x1xf32> to vector<1x1xf32>
      %58 = vector.broadcast %57 : vector<1x1xf32> to vector<8x128xf32>
      %c0_21 = arith.constant 0 : index
      %c0_22 = arith.constant 0 : index
      %59 = vector.load %arg5[%c0_21, %c0_22] : memref<8x128xf32, #tpu.memory_space<vmem>>, vector<8x128xf32>
      tpu.vector_store %arg5[%c0_21, %c0_22], %58 {strides = array<i32>} : memref<8x128xf32, #tpu.memory_space<vmem>>, vector<8x128xf32>,
    } else {
    }
    return
  }
  func.func @transform_0(%arg0: i32, %arg1: i32) -> (i32, i32) {
    %c1_i32 = arith.constant 1 : i32
    %0 = arith.muli %arg0, %c1_i32 : i32
    %1 = arith.addi %0, %arg1 : i32
    %c0_i32 = arith.constant 0 : i32
    %c0_i32_0 = arith.constant 0 : i32
    return %1, %c0_i32 : i32, i32
  }
  func.func @transform_1(%arg0: i32, %arg1: i32) -> (i32, i32) {
    %c0_i32 = arith.constant 0 : i32
    %c0_i32_0 = arith.constant 0 : i32
    %c0_i32_1 = arith.constant 0 : i32
    return %c0_i32, %c0_i32_0 : i32, i32
  }
  func.func @transform_2(%arg0: i32, %arg1: i32) -> (i32, i32) {
    %c1_i32 = arith.constant 1 : i32
    %0 = arith.muli %arg0, %c1_i32 : i32
    %1 = arith.addi %0, %arg1 : i32
    %c0_i32 = arith.constant 0 : i32
    %c0_i32_0 = arith.constant 0 : i32
    return %1, %c0_i32 : i32, i32
  }
  func.func @transform_3(%arg0: i32, %arg1: i32) -> (i32, i32) {
    %c0_i32 = arith.constant 0 : i32
    %c0_i32_0 = arith.constant 0 : i32
    return %arg0, %c0_i32 : i32, i32
  }
}

</mosaic_0001>

<bundles_post_ra>
// kernel: _bigram_train.1
= control target key start
LH: loop header
LB: loop body
LE: loop exit
PB: predicated region body
PF: predicated region fallthrough
CT: control target
= control target key end

     0   :  { %9 = vsyncpa [#allocation4], 0  ;;  %s512_s0 = inlined_call_operand.vmem [shape: s32[16,2], index: 0, kind: input, shape index: {}]   ;;  %s513_s1 = inlined_call_operand.hbm [shape: f32[128,128], index: 1, kind: input, shape index: {}]   ;;  %s514_s2 = inlined_call_operand.hbm [shape: f32[16,128], index: 2, kind: output, shape index: {0}]   ;;  %s515_s3 = inlined_call_operand.vmem [shape: f32[8,128], index: 3, kind: output, shape index: {1}]  }
   0x1   :  { %10 = vsyncpa [#allocation5], 0  ;;  %s445_s12 = smov [#allocation3]   ;;  %s397_s16 = scalar_lea.hbm %s513_s1, 2048 }
   0x2   :  { %s26_s13 = sshll.u32 %s445_s12, 4  ;;  %p398_p0 = scmp.ne.s32.totalorder %s513_s1, %s397_s16  ;;  %s27_s13 = int_to_ptr.vmem [resolvable:$true] %s26_s13 }
   0x3   :  { %p401_p1 = scmp.lt.u32.totalorder %s397_s16, %s513_s1 }
   0x5   :  { %p403_p2 = pnand %p401_p1, %p398_p0 }
   0x7   :  { %406 = shalt.err (!%p403_p2)
}
   0x8   :  { %s407_s21 = scalar_lea.vmem %s27_s13, 2048  ;;  %p412_p4 = scmp.lt.s32.totalorder %s27_s13, %s27_s13 }
   0x9   :  { %p408_p3 = scmp.ne.s32.totalorder %s27_s13, %s407_s21  ;;  %p413_p5 = scmp.lt.s32.totalorder %s407_s21, %s407_s21 }
   0xb   :  { %p414_p6 = por %p413_p5, %p412_p4 }
   0xd   :  { %p415_p7 = pnand %p414_p6, %p408_p3 }
   0xf   :  { %418 = shalt.err (!%p415_p7)
}
  0x10   :  { %s446_s22 = smov 128   ;;  %s447_s23 = smov 8  }
  0x11   :  { %32 = dma.hbm_to_vmem [thread:$0]  %s513_s1, 2048, %s27_s13, [#allocation4], %s446_s22, %s446_s22, %s447_s23  }
  0x12   :  { %441 = dma.done.wait [#allocation4], 2048  }
  0x13   :  { %442 = vsyncadd [#allocation4], 4294965248  ;;  %v448_v0 = vmov 0   ;;  %v53_v1 = vld [vmem:[%s512_s0] sm:$0xff]  ;;  %v56_v3 = vld [vmem:[#allocation3 + $0x8] sm:$0xff]  ;;  %v449_v14 = vmov 1   ;;  %v71_v28 = vlaneseq }
  0x14   :  { %385 = vset.pattern.permute.xlu0 %v448_v0  ;;  %v55_v2 = vld [vmem:[#allocation3] sm:$0xff]  ;;  %v57_v4 = vld [vmem:[#allocation3 + $0x10] sm:$0xff]  ;;  %v58_v5 = vld [vmem:[#allocation3 + $0x18] sm:$0xff]  ;;  %387 = vset.pattern.permute.xlu1 %v449_v14  ;;  %v450_v31 = vmov 1.0   ;;  %vm214_vm5 = vcmask 7168   ;;  %vm233_vm6 = vcmask 0  }
  0x15   :  { %74 = vperm.xlu0 %385, %v53_v1   ;;  %v54_v6 = vld [vmem:[%s512_s0 + $0x8] sm:$0xff]  ;;  %v343_v7 = vpack.c.bf16 %v56_v3, %v55_v2  ;;  %v347_v8 = vpack.c.bf16 %v58_v5, %v57_v4  ;;  %v61_v12 = vld [vmem:[#allocation3 + $0x30] sm:$0xff]  ;;  %v62_v13 = vld [vmem:[#allocation3 + $0x38] sm:$0xff]  ;;  %v72_v29 = vand.u32 127, %v71_v28  ;;  %s452_s1 = smov [#allocation6]  }
  0x16   :  { %v59_v9 = vld [vmem:[#allocation3 + $0x20] sm:$0xff]  ;;  %v60_v10 = vld [vmem:[#allocation3 + $0x28] sm:$0xff]  ;;  %v355_v15 = vpack.c.bf16 %v62_v13, %v61_v12  ;;  %v65_v19 = vld [vmem:[#allocation3 + $0x50] sm:$0xff]  ;;  %s263_s30 = sshll.u32 %s452_s1, 4  ;;  %s264_s30 = int_to_ptr.vmem [resolvable:$true] %s263_s30 }
  0x17   :  { %344 = vmatprep.subr.bf16.mxu0 %v343_v7  ;;  %v351_v11 = vpack.c.bf16 %v60_v10, %v59_v9  ;;  %v63_v16 = vld [vmem:[#allocation3 + $0x40] sm:$0xff]  ;;  %v64_v17 = vld [vmem:[#allocation3 + $0x48] sm:$0xff]  ;;  %v66_v20 = vld [vmem:[#allocation3 + $0x58] sm:$0xff]  ;;  %vm160_vm2 = vcmp.lt.s32.totalorder %v72_v29, 65  ;;  %s419_s4 = scalar_lea.vmem %s264_s30, 256  ;;  %p424_p9 = scmp.lt.s32.totalorder %s264_s30, %s264_s30 }
  0x18   :  { %346 = vmatpush3.bf16.msra.mxu0 %v343_v7  ;;  %v359_v18 = vpack.c.bf16 %v64_v17, %v63_v16  ;;  %v363_v21 = vpack.c.bf16 %v66_v20, %v65_v19  ;;  %v67_v22 = vld [vmem:[#allocation3 + $0x60] sm:$0xff]  ;;  %v68_v23 = vld [vmem:[#allocation3 + $0x68] sm:$0xff]  ;;  %v69_v25 = vld [vmem:[#allocation3 + $0x70] sm:$0xff]  ;;  %p420_p8 = scmp.ne.s32.totalorder %s264_s30, %s419_s4  ;;  %p425_p10 = scmp.lt.s32.totalorder %s419_s4, %s419_s4 }
  0x19   :  { %77 = vperm.xlu0 %385, %v54_v6   ;;  %348 = vmatprep.subr.bf16.mxu0 %v347_v8  ;;  %v367_v24 = vpack.c.bf16 %v68_v23, %v67_v22  ;;  %v70_v26 = vld [vmem:[#allocation3 + $0x78] sm:$0xff] }
  0x1a   :  { %v371_v27 = vpack.c.bf16 %v70_v26, %v69_v25  ;;  %p426_p11 = por %p425_p10, %p424_p9 }
  0x1c   :  { %350 = vmatpush3.bf16.msra.mxu0 %v347_v8  ;;  %p427_p12 = pnand %p426_p11, %p420_p8 }
  0x1d   :  { %386 = vset.pattern.permute.xlu0 %v449_v14  ;;  %352 = vmatprep.subr.bf16.mxu0 %v351_v11 }
  0x1e   :  { %184 = vperm.xlu0 %386, %v53_v1  }
  0x20   :  { %354 = vmatpush3.bf16.msra.mxu0 %v351_v11 }
  0x21   :  { %356 = vmatprep.subr.bf16.mxu0 %v355_v15 }
  0x22   :  { %388 = vset.pattern.permute.xlu0 %v448_v0  ;;  %v451_v0 = vmov 0.0  }
  0x23   :  { %234 = vst.msk [vmem:[#allocation2] sm:$0x1] %vm233_vm6, %v451_v0 }
  0x24   :  { %358 = vmatpush3.bf16.msra.mxu0 %v355_v15 }
  0x25   :  { %360 = vmatprep.subr.bf16.mxu0 %v359_v18 }
  0x28   :  { %362 = vmatpush3.bf16.msra.mxu0 %v359_v18 }
  0x29   :  { %364 = vmatprep.subr.bf16.mxu0 %v363_v21 }
  0x2a   :  { %v235_v8 = vld [vmem:[#allocation2] sm:$0x1] }
  0x2c   :  { %366 = vmatpush3.bf16.msra.mxu0 %v363_v21 }
  0x2d   :  { %368 = vmatprep.subr.bf16.mxu0 %v367_v24 }
  0x30   :  { %370 = vmatpush3.bf16.msra.mxu0 %v367_v24 }
  0x31   :  { %372 = vmatprep.subr.bf16.mxu0 %v371_v27 }
  0x34   :  { %374 = vmatpush3.bf16.msra.mxu0 %v371_v27 }
  0x94   :  { %v75_v30 = vpop.permute.xlu0 %74 }
  0x95   :  { %vm79_vm0 = vcmp.eq.s32.totalorder %v72_v29, %v75_v30 }
  0x96   :  { %340 = vmatprep.mubr.msk.f32.mxu0 %vm79_vm0, %v450_v31 }
  0x98   :  { %v78_v32 = vpop.permute.xlu0 %77 }
  0x99   :  { %vm80_vm1 = vcmp.eq.s32.totalorder %v72_v29, %v78_v32 }
  0x9a   :  { %341 = vmatmul.mubr.msk.f32.vlgmr.msra.gmra.mrb[0].mxu0 %vm80_vm1, %v450_v31 }
  0x9d   :  { %v185_v44 = vpop.permute.xlu0 %184 }
  0x9e   :  { %vm189_vm3 = vcmp.eq.s32.totalorder %v72_v29, %v185_v44 }
 0x16d   :  { %v342_v33 = vpop.f32.mrb[0].mxu0 }
 0x16e   :  { %228 = vst [vmem:[#allocation6 + $0x8] sm:$0xff] %v342_v33  ;;  %v151_v34 = vpop.f32.mrb[1].mxu0  ;;  %v162_v35 = vsel %vm160_vm2, %v342_v33, -1e+30 }
 0x16f   :  { %227 = vst [vmem:[#allocation6] sm:$0xff] %v151_v34  ;;  %165 = vmax.xlane.f32.xlu1 %v162_v35  ;;  %v161_v36 = vsel %vm160_vm2, %v151_v34, -1e+30  ;;  %v191_v47 = vsel %vm189_vm3, %v151_v34, 0.0 }
 0x173   :  { %163 = vmax.xlane.f32.xlu1 %v161_v36 }
 0x184   :  { %187 = vperm.xlu1 %387, %v54_v6  }
 0x1fc   :  { %v166_v37 = vpop.xlane.xlu1 %165 }
 0x1fd   :  { %v168_v38 = vsub.f32 %v162_v35, %v166_v37 }
 0x1ff   :  { %v171_v39 = vmul.f32 1.442695, %v168_v38 }
 0x200   :  { %v164_v40 = vpop.xlane.xlu1 %163 }
 0x201   :  { %389 = vpow2.f32 %v171_v39  ;;  %v167_v41 = vsub.f32 %v161_v36, %v164_v40 }
 0x203   :  { %v169_v42 = vmul.f32 1.442695, %v167_v41 }
 0x204   :  { %v188_v46 = vpop.permute.xlu1 %187 }
 0x205   :  { %391 = vpow2.f32 %v169_v42  ;;  %vm190_vm4 = vcmp.eq.s32.totalorder %v72_v29, %v188_v46 }
 0x206   :  { %v192_v48 = vsel %vm190_vm4, %v342_v33, 0.0 }
 0x20b   :  { %v390_v43 = vpop.eup %389 }
 0x20c   :  { %175 = vadd.xlane.f32.xlu1 %v390_v43 }
 0x20f   :  { %v392_v45 = vpop.eup %391 }
 0x210   :  { %173 = vadd.xlane.f32.xlu0 %v392_v45 }
 0x214   :  { %193 = vadd.xlane.f32.xlu0 %v191_v47 }
 0x218   :  { %195 = vadd.xlane.f32.xlu0 %v192_v48 }
 0x299   :  { %v176_v49 = vpop.xlane.xlu1 %175 }
 0x29a   :  { %393 = vlog2.f32 %v176_v49 }
 0x29d   :  { %v174_v50 = vpop.xlane.xlu0 %173 }
 0x29e   :  { %395 = vlog2.f32 %v174_v50 }
 0x2a1   :  { %v194_v52 = vpop.xlane.xlu0 %193 }
 0x2a4   :  { %v394_v51 = vpop.eup %393 }
 0x2a5   :  { %v180_v53 = vmul.f32 0.6931472, %v394_v51  ;;  %v196_v57 = vpop.xlane.xlu0 %195 }
 0x2a7   :  { %v182_v54 = vadd.f32 %v180_v53, %v166_v37 }
 0x2a8   :  { %v396_v55 = vpop.eup %395 }
 0x2a9   :  { %v178_v56 = vmul.f32 0.6931472, %v396_v55  ;;  %v211_v59 = vsub.f32 %v182_v54, %v196_v57 }
 0x2ab   :  { %v181_v58 = vadd.f32 %v178_v56, %v164_v40  ;;  %v216_v62 = vsel %vm214_vm5, %v211_v59, 0.0 }
 0x2ad   :  { %v210_v60 = vsub.f32 %v181_v58, %v194_v52 }
 0x2af   :  { %v215_v61 = vsel %vm214_vm5, %v210_v60, 0.0 }
 0x2b0   :  { %v217_v63 = vadd.f32 %v216_v62, %v215_v61 }
 0x2b2   :  { %218 = vadd.xlane.f32.xlu0 %v217_v63 }
 0x33f   :  { %v219_v1 = vpop.xlane.xlu0 %218 }
 0x340   :  { %v220_v2 = vrot.slane %v219_v1, 4 }
 0x342   :  { %v221_v3 = vadd.f32 %v220_v2, %v219_v1 }
 0x344   :  { %v222_v4 = vrot.slane %v221_v3, 2 }
 0x346   :  { %v223_v5 = vadd.f32 %v222_v4, %v221_v3 }
 0x348   :  { %v224_v6 = vrot.slane %v223_v5, 1 }
 0x34a   :  { %v225_v7 = vadd.f32 %v224_v6, %v223_v5 }
 0x34c   :  { %375 = vpush %v225_v7 }
 0x37d   :  { %s376_s0 = spop %375 }
 0x37e   :  { %v236_v9 = vstv %s376_s0 }
 0x37f   :  { %v237_v10 = vadd.f32 %v236_v9, %v235_v8 }
 0x381   :  { %239 = vst.msk [vmem:[#allocation2] sm:$0x1] %vm233_vm6, %v237_v10 }
 0x388   :  { %v289_v11 = vld [vmem:[#allocation2] ss:$0 sm:$0xff] }
 0x389   :  { %250 = vperm.xlu0 %388, %v289_v11  }
 0x38a   :  { %430 = shalt.err (!%p427_p12)
}
 0x38b   :  { %s431_s7 = scalar_lea.hbm %s514_s2, 256 }
 0x38c   :  { %p432_p13 = scmp.ne.s32.totalorder %s514_s2, %s431_s7  ;;  %p435_p0 = scmp.lt.u32.totalorder %s431_s7, %s514_s2 }
 0x38e   :  { %p437_p1 = pnand %p435_p0, %p432_p13 }
 0x390   :  { %440 = shalt.err (!%p437_p1)
}
 0x391   :  { %269 = dma.vmem_to_hbm [thread:$0]  %s264_s30, 256, %s514_s2, [#allocation5], %s446_s22, %s446_s22, %s447_s23  }
 0x408   :  { %v251_v12 = vpop.permute.xlu0 %250 }
 0x409   :  { %253 = vst [vmem:[%s515_s3] sm:$0xff] %v251_v12 }
 0x40a   :  { %443 = dma.done.wait [#allocation5], 256  }
 0x40b   :  { %444 = vsyncadd [#allocation5], 4294967040 }
 0x40c   :  { %277 = vsyncpa [#allocation4], 1 }
 0x40d   :  { %278 = vsyncpa [#allocation5], 1 }

</bundles_post_ra>
